<compile_context>
chip_gen: v7x
topology: tpu7x:2x2x1
jax: 0.10.0
libtpu: 0.0.40
codegen_flags: <defaults>
</compile_context>

<pallas_src>
import jax
import jax.numpy as jnp
from jax.experimental import pallas as pl
from jax.experimental.pallas import tpu as pltpu

# ----------------------------- config (small, synthetic) ---------------------
B = 2            # batch
S = 8            # sequence length
H = 32           # hidden_size (stand-in for 768)
NUM_HEADS = 2
HEAD_DIM = H // NUM_HEADS
INTERMEDIATE = 64
NUM_LAYERS = 2
VOCAB = 100
TYPE_VOCAB = 2
NUM_CLASSES = 7  # len(label_cols) = 7
LN_EPS = 1e-12
DR_RATE = 0.5    # module's dropout; identity at inference (eval mode)


# ----------------------------- in-kernel helpers (f32 math) ------------------
def _ln(x, g, b):
    mean = jnp.mean(x, axis=-1, keepdims=True)
    c = x - mean
    var = jnp.mean(c * c, axis=-1, keepdims=True)
    return c * jax.lax.rsqrt(var + jnp.float32(LN_EPS)) * g + b


def _gelu(x):
    # tanh approximation of GELU (BERT intermediate activation), f32 math
    c = jnp.float32(0.7978845608028654)  # sqrt(2/pi)
    return 0.5 * x * (1.0 + jnp.tanh(c * (x + 0.044715 * x * x * x)))


# ----------------------------- fused encoder layer ----------------------------
def _encoder_layer_kernel(x_ref, bias_ref,
                          wqkv_ref, bqkv_ref, wo_ref, bo_ref,
                          ln1g_ref, ln1b_ref,
                          wi_ref, bi_ref, wo2_ref, bo2_ref,
                          ln2g_ref, ln2b_ref,
                          o_ref):
    x = x_ref[...]                                   # [S, H] f32 (this batch's rows)
    bias = bias_ref[0]                               # [1, S] additive key mask

    # Fused QKV projection (Wq / bq pre-scaled by 1/sqrt(head_dim) on host).
    qkv = jnp.dot(x.astype(jnp.bfloat16), wqkv_ref[...],
                  preferred_element_type=jnp.float32) + bqkv_ref[...]   # [S, 3H] f32

    wo = wo_ref[...]                                 # [H, H] bf16
    attn_acc = jnp.zeros((S, H), jnp.float32)

    # Per-head attention; heads are lane slices of the [S, 3H] projection,
    # and the output projection is folded into the head loop so the
    # [S, Dh]-per-head context is never materialized in HBM.
    for h in range(NUM_HEADS):
        lo = h * HEAD_DIM
        q_h = qkv[:, lo:lo + HEAD_DIM].astype(jnp.bfloat16)              # [S, Dh]
        k_h = qkv[:, H + lo:H + lo + HEAD_DIM].astype(jnp.bfloat16)      # [S, Dh]
        v_h = qkv[:, 2 * H + lo:2 * H + lo + HEAD_DIM].astype(jnp.bfloat16)

        scores = jax.lax.dot_general(
            q_h, k_h, dimension_numbers=(((1,), (1,)), ((), ())),
            preferred_element_type=jnp.float32)                          # [S, S] f32
        scores = scores + bias
        scores = scores - jnp.max(scores, axis=-1, keepdims=True)
        p = jnp.exp(scores)
        p = p * pl.reciprocal(jnp.sum(p, axis=-1, keepdims=True), approx=True)

        ctx_h = jnp.dot(p.astype(jnp.bfloat16), v_h,
                        preferred_element_type=jnp.float32)              # [S, Dh]
        attn_acc = attn_acc + jnp.dot(
            ctx_h.astype(jnp.bfloat16), wo[lo:lo + HEAD_DIM, :],
            preferred_element_type=jnp.float32)                          # [S, H]

    attn_out = attn_acc + bo_ref[...]
    h1 = _ln(attn_out + x, ln1g_ref[...], ln1b_ref[...])                 # [S, H]

    ffn = _gelu(jnp.dot(h1.astype(jnp.bfloat16), wi_ref[...],
                        preferred_element_type=jnp.float32) + bi_ref[...])
    ffn_out = jnp.dot(ffn.astype(jnp.bfloat16), wo2_ref[...],
                      preferred_element_type=jnp.float32) + bo2_ref[...]
    o_ref[...] = _ln(ffn_out + h1, ln2g_ref[...], ln2b_ref[...])


def encoder_layer(h2d, bias, layer):
    """h2d: [B*S, H] f32, bias: [B, 1, S] f32 -> [B*S, H] f32. One pallas_call."""
    def w_spec(shape):
        return pl.BlockSpec(shape, lambda b, _s=shape: (0,) * len(_s))

    return pl.pallas_call(
        _encoder_layer_kernel,
        grid=(B,),
        in_specs=[
            pl.BlockSpec((S, H), lambda b: (b, 0)),        # hidden rows of batch b
            pl.BlockSpec((1, 1, S), lambda b: (b, 0, 0)),  # additive key mask
            w_spec((H, 3 * H)), w_spec((1, 3 * H)),        # fused QKV
            w_spec((H, H)), w_spec((1, H)),                # attn output proj
            w_spec((1, H)), w_spec((1, H)),                # LN1 gamma/beta
            w_spec((H, INTERMEDIATE)), w_spec((1, INTERMEDIATE)),
            w_spec((INTERMEDIATE, H)), w_spec((1, H)),
            w_spec((1, H)), w_spec((1, H)),                # LN2 gamma/beta
        ],
        out_specs=pl.BlockSpec((S, H), lambda b: (b, 0)),
        out_shape=jax.ShapeDtypeStruct((B * S, H), jnp.float32),
        compiler_params=pltpu.CompilerParams(dimension_semantics=("parallel",)),
    )(h2d, bias,
      layer["wqkv"], layer["bqkv"], layer["wo"], layer["bo"],
      layer["ln1_g"], layer["ln1_b"],
      layer["wi"], layer["bi"], layer["wo2"], layer["bo2"],
      layer["ln2_g"], layer["ln2_b"])


# ----------------------------- embedding layernorm ----------------------------
def _embed_ln_kernel(x_ref, g_ref, b_ref, o_ref):
    o_ref[...] = _ln(x_ref[...], g_ref[...], b_ref[...])


def embed_layernorm(x, g, b):
    M, N = x.shape
    return pl.pallas_call(
        _embed_ln_kernel,
        grid=(1,),
        in_specs=[pl.BlockSpec((M, N), lambda i: (0, 0)),
                  pl.BlockSpec((1, N), lambda i: (0, 0)),
                  pl.BlockSpec((1, N), lambda i: (0, 0))],
        out_specs=pl.BlockSpec((M, N), lambda i: (0, 0)),
        out_shape=jax.ShapeDtypeStruct((M, N), jnp.float32),
    )(x, g, b)


# ----------------------------- pooler + classifier (fused) --------------------
def _head_kernel(cls_ref, wp_ref, bp_ref, wc_ref, bc_ref, o_ref):
    pooled = jnp.tanh(jnp.dot(cls_ref[...].astype(jnp.bfloat16), wp_ref[...],
                              preferred_element_type=jnp.float32) + bp_ref[...])
    # dropout(p=dr_rate) is identity at inference (eval mode) -> no-op here.
    o_ref[...] = jnp.dot(pooled.astype(jnp.bfloat16), wc_ref[...],
                         preferred_element_type=jnp.float32) + bc_ref[...]


def pooler_classifier(cls, wp, bp, wc, bc):
    return pl.pallas_call(
        _head_kernel,
        grid=(1,),
        in_specs=[pl.BlockSpec((B, H), lambda i: (0, 0)),
                  pl.BlockSpec((H, H), lambda i: (0, 0)),
                  pl.BlockSpec((1, H), lambda i: (0, 0)),
                  pl.BlockSpec((H, NUM_CLASSES), lambda i: (0, 0)),
                  pl.BlockSpec((1, NUM_CLASSES), lambda i: (0, 0))],
        out_specs=pl.BlockSpec((B, NUM_CLASSES), lambda i: (0, 0)),
        out_shape=jax.ShapeDtypeStruct((B, NUM_CLASSES), jnp.float32),
    )(cls, wp, bp, wc, bc)


# ----------------------------- parameter init --------------------------------
def _dense(key, fan_in, fan_out):
    w = jax.random.normal(key, (fan_in, fan_out), jnp.float32) * 0.02
    b = jnp.zeros((fan_out,), jnp.float32)
    return w, b


def init_params(key):
    keys = iter(jax.random.split(key, 8 + NUM_LAYERS * 6))
    inv_sqrt_dh = jnp.float32(1.0 / (HEAD_DIM ** 0.5))
    params = {
        "word_emb": jax.random.normal(next(keys), (VOCAB, H), jnp.float32) * 0.02,
        "pos_emb": jax.random.normal(next(keys), (S, H), jnp.float32) * 0.02,
        "type_emb": jax.random.normal(next(keys), (TYPE_VOCAB, H), jnp.float32) * 0.02,
        "emb_ln_g": jnp.ones((1, H), jnp.float32),
        "emb_ln_b": jnp.zeros((1, H), jnp.float32),
        "layers": [],
    }
    wp, bp = _dense(next(keys), H, H)
    wc, bc = _dense(next(keys), H, NUM_CLASSES)
    params["pooler_w"] = wp.astype(jnp.bfloat16)
    params["pooler_b"] = bp.reshape(1, H)
    params["cls_w"] = wc.astype(jnp.bfloat16)
    params["cls_b"] = bc.reshape(1, NUM_CLASSES)

    for _ in range(NUM_LAYERS):
        wq, bq = _dense(next(keys), H, H)
        wk, bk = _dense(next(keys), H, H)
        wv, bv = _dense(next(keys), H, H)
        wo, bo = _dense(next(keys), H, H)
        wi, bi = _dense(next(keys), H, INTERMEDIATE)
        wo2, bo2 = _dense(next(keys), INTERMEDIATE, H)
        # Fold 1/sqrt(head_dim) into the Q projection (saves an O(S^2) scale
        # per head inside the kernel). Pack QKV into one [H, 3H] matmul.
        wqkv = jnp.concatenate([wq * inv_sqrt_dh, wk, wv], axis=1)
        bqkv = jnp.concatenate([bq * inv_sqrt_dh, bk, bv], axis=0)
        params["layers"].append({
            "wqkv": wqkv.astype(jnp.bfloat16),
            "bqkv": bqkv.reshape(1, 3 * H),
            "wo": wo.astype(jnp.bfloat16), "bo": bo.reshape(1, H),
            "wi": wi.astype(jnp.bfloat16), "bi": bi.reshape(1, INTERMEDIATE),
            "wo2": wo2.astype(jnp.bfloat16), "bo2": bo2.reshape(1, H),
            "ln1_g": jnp.ones((1, H), jnp.float32),
            "ln1_b": jnp.zeros((1, H), jnp.float32),
            "ln2_g": jnp.ones((1, H), jnp.float32),
            "ln2_b": jnp.zeros((1, H), jnp.float32),
        })
    return params


# ----------------------------- forward pass -----------------------------------
def bert_classifier_forward(params, token_ids, valid_length, segment_ids):
    # generate_attention_mask: attention_mask[i][:valid_length[i]] = 1
    mask = (jnp.arange(S)[None, :] < valid_length[:, None]).astype(jnp.float32)  # [B, S]
    bias = ((1.0 - mask) * jnp.float32(-1e9)).reshape(B, 1, S)  # additive key-mask bias

    # embeddings (gather is plain-JAX glue), then Pallas layernorm
    pos_ids = jnp.arange(S)
    h = (jnp.take(params["word_emb"], token_ids, axis=0)
         + params["pos_emb"][pos_ids][None, :, :]
         + jnp.take(params["type_emb"], segment_ids, axis=0))                    # [B, S, H]
    h = embed_layernorm(h.reshape(B * S, H), params["emb_ln_g"], params["emb_ln_b"])

    # one fused pallas_call per encoder layer; activations stay [B*S, H]
    for layer in params["layers"]:
        h = encoder_layer(h, bias, layer)

    # BERT pooler (tanh on [CLS]) + 7-class classifier, fused into one kernel.
    cls = h.reshape(B, S, H)[:, 0, :]                                            # [B, H]
    logits = pooler_classifier(cls, params["pooler_w"], params["pooler_b"],
                               params["cls_w"], params["cls_b"])                 # [B, 7]
    return logits


# ----------------------------- main -------------------------------------------
if __name__ == "__main__":
    key = jax.random.PRNGKey(0)
    k_params, k_tok = jax.random.split(key)

    params = init_params(k_params)
    token_ids = jax.random.randint(k_tok, (B, S), 0, VOCAB, dtype=jnp.int32)
    valid_length = jnp.array([5, 8], dtype=jnp.int32)
    segment_ids = jnp.zeros((B, S), dtype=jnp.int32)

    fwd = jax.jit(bert_classifier_forward)
    logits = fwd(params, token_ids, valid_length, segment_ids)
    jax.block_until_ready(logits)

    assert logits.shape == (B, NUM_CLASSES) and logits.dtype == jnp.float32
    print("KERNEL_OK")
</pallas_src>

<mosaic_0001>
module attributes {stable_mosaic.version = 11 : i64} {
  func.func @_embed_ln_kernel(%arg0: i32, %arg1: memref<16x32xf32, #tpu.memory_space<vmem>>, %arg2: memref<1x32xf32, #tpu.memory_space<vmem>>, %arg3: memref<1x32xf32, #tpu.memory_space<vmem>>, %arg4: memref<16x32xf32, #tpu.memory_space<vmem>>) attributes {dimension_semantics = [#tpu.dimension_semantics<arbitrary>], iteration_bounds = array<i64: 1>, scalar_prefetch = 0 : i64, scratch_operands = 0 : i64, tpu.core_type = #tpu.core_type<tc>, window_params = [{pipeline_mode = #tpu.pipeline_mode<synchronous>, transform_indices = @transform_0, window_bounds = array<i64: 16, 32>}, {pipeline_mode = #tpu.pipeline_mode<synchronous>, transform_indices = @transform_1, window_bounds = array<i64: 1, 32>}, {pipeline_mode = #tpu.pipeline_mode<synchronous>, transform_indices = @transform_2, window_bounds = array<i64: 1, 32>}, {pipeline_mode = #tpu.pipeline_mode<synchronous>, transform_indices = @transform_3, window_bounds = array<i64: 16, 32>}]} {
    %c0 = arith.constant 0 : index
    %c0_0 = arith.constant 0 : index
    %0 = vector.load %arg1[%c0, %c0_0] : memref<16x32xf32, #tpu.memory_space<vmem>>, vector<16x32xf32>
    %c0_1 = arith.constant 0 : index
    %c0_2 = arith.constant 0 : index
    %1 = vector.load %arg2[%c0_1, %c0_2] : memref<1x32xf32, #tpu.memory_space<vmem>>, vector<1x32xf32>
    %c0_3 = arith.constant 0 : index
    %c0_4 = arith.constant 0 : index
    %2 = vector.load %arg3[%c0_3, %c0_4] : memref<1x32xf32, #tpu.memory_space<vmem>>, vector<1x32xf32>
    %cst = arith.constant dense<0.000000e+00> : vector<16xf32>
    %3 = vector.multi_reduction <add>, %0, %cst [1] : vector<16x32xf32> to vector<16xf32>
    %4 = vector.shape_cast %3 : vector<16xf32> to vector<16x1xf32>
    %cst_5 = arith.constant 3.200000e+01 : f32
    %5 = vector.broadcast %cst_5 : f32 to vector<16x1xf32>
    %6 = arith.divf %4, %5 : vector<16x1xf32>
    %7 = vector.broadcast %6 : vector<16x1xf32> to vector<16x32xf32>
    %8 = arith.subf %0, %7 : vector<16x32xf32>
    %9 = arith.mulf %8, %8 : vector<16x32xf32>
    %cst_6 = arith.constant dense<0.000000e+00> : vector<16xf32>
    %10 = vector.multi_reduction <add>, %9, %cst_6 [1] : vector<16x32xf32> to vector<16xf32>
    %11 = vector.shape_cast %10 : vector<16xf32> to vector<16x1xf32>
    %cst_7 = arith.constant 3.200000e+01 : f32
    %12 = vector.broadcast %cst_7 : f32 to vector<16x1xf32>
    %13 = arith.divf %11, %12 : vector<16x1xf32>
    %cst_8 = arith.constant 9.99999996E-13 : f32
    %14 = vector.broadcast %cst_8 : f32 to vector<16x1xf32>
    %15 = arith.addf %13, %14 : vector<16x1xf32>
    %16 = math.rsqrt %15 : vector<16x1xf32>
    %17 = vector.broadcast %16 : vector<16x1xf32> to vector<16x32xf32>
    %18 = arith.mulf %8, %17 : vector<16x32xf32>
    %19 = vector.broadcast %1 : vector<1x32xf32> to vector<16x32xf32>
    %20 = arith.mulf %18, %19 : vector<16x32xf32>
    %21 = vector.broadcast %2 : vector<1x32xf32> to vector<16x32xf32>
    %22 = arith.addf %20, %21 : vector<16x32xf32>
    %c0_9 = arith.constant 0 : index
    %c0_10 = arith.constant 0 : index
    %23 = vector.load %arg4[%c0_9, %c0_10] : memref<16x32xf32, #tpu.memory_space<vmem>>, vector<16x32xf32>
    tpu.vector_store %arg4[%c0_9, %c0_10], %22 {strides = array<i32>} : memref<16x32xf32, #tpu.memory_space<vmem>>, vector<16x32xf32>,
    return
  }
  func.func @transform_0(%arg0: i32) -> (i32, i32) {
    %c0_i32 = arith.constant 0 : i32
    %c0_i32_0 = arith.constant 0 : i32
    %c0_i32_1 = arith.constant 0 : i32
    return %c0_i32, %c0_i32_0 : i32, i32
  }
  func.func @transform_1(%arg0: i32) -> (i32, i32) {
    %c0_i32 = arith.constant 0 : i32
    %c0_i32_0 = arith.constant 0 : i32
    %c0_i32_1 = arith.constant 0 : i32
    return %c0_i32, %c0_i32_0 : i32, i32
  }
  func.func @transform_2(%arg0: i32) -> (i32, i32) {
    %c0_i32 = arith.constant 0 : i32
    %c0_i32_0 = arith.constant 0 : i32
    %c0_i32_1 = arith.constant 0 : i32
    return %c0_i32, %c0_i32_0 : i32, i32
  }
  func.func @transform_3(%arg0: i32) -> (i32, i32) {
    %c0_i32 = arith.constant 0 : i32
    %c0_i32_0 = arith.constant 0 : i32
    %c0_i32_1 = arith.constant 0 : i32
    return %c0_i32, %c0_i32_0 : i32, i32
  }
}

module attributes {stable_mosaic.version = 11 : i64} {
  func.func @_encoder_layer_kernel(%arg0: i32, %arg1: memref<8x32xf32, #tpu.memory_space<vmem>>, %arg2: memref<1x1x8xf32, #tpu.memory_space<vmem>>, %arg3: memref<32x96xbf16, #tpu.memory_space<vmem>>, %arg4: memref<1x96xf32, #tpu.memory_space<vmem>>, %arg5: memref<32x32xbf16, #tpu.memory_space<vmem>>, %arg6: memref<1x32xf32, #tpu.memory_space<vmem>>, %arg7: memref<1x32xf32, #tpu.memory_space<vmem>>, %arg8: memref<1x32xf32, #tpu.memory_space<vmem>>, %arg9: memref<32x64xbf16, #tpu.memory_space<vmem>>, %arg10: memref<1x64xf32, #tpu.memory_space<vmem>>, %arg11: memref<64x32xbf16, #tpu.memory_space<vmem>>, %arg12: memref<1x32xf32, #tpu.memory_space<vmem>>, %arg13: memref<1x32xf32, #tpu.memory_space<vmem>>, %arg14: memref<1x32xf32, #tpu.memory_space<vmem>>, %arg15: memref<8x32xf32, #tpu.memory_space<vmem>>) attributes {dimension_semantics = [#tpu.dimension_semantics<parallel>], iteration_bounds = array<i64: 2>, scalar_prefetch = 0 : i64, scratch_operands = 0 : i64, tpu.core_type = #tpu.core_type<tc>, window_params = [{transform_indices = @transform_0, window_bounds = array<i64: 8, 32>}, {transform_indices = @transform_1, window_bounds = array<i64: 1, 1, 8>}, {pipeline_mode = #tpu.pipeline_mode<synchronous>, transform_indices = @transform_2, window_bounds = array<i64: 32, 96>}, {pipeline_mode = #tpu.pipeline_mode<synchronous>, transform_indices = @transform_3, window_bounds = array<i64: 1, 96>}, {pipeline_mode = #tpu.pipeline_mode<synchronous>, transform_indices = @transform_4, window_bounds = array<i64: 32, 32>}, {pipeline_mode = #tpu.pipeline_mode<synchronous>, transform_indices = @transform_5, window_bounds = array<i64: 1, 32>}, {pipeline_mode = #tpu.pipeline_mode<synchronous>, transform_indices = @transform_6, window_bounds = array<i64: 1, 32>}, {pipeline_mode = #tpu.pipeline_mode<synchronous>, transform_indices = @transform_7, window_bounds = array<i64: 1, 32>}, {pipeline_mode = #tpu.pipeline_mode<synchronous>, transform_indices = @transform_8, window_bounds = array<i64: 32, 64>}, {pipeline_mode = #tpu.pipeline_mode<synchronous>, transform_indices = @transform_9, window_bounds = array<i64: 1, 64>}, {pipeline_mode = #tpu.pipeline_mode<synchronous>, transform_indices = @transform_10, window_bounds = array<i64: 64, 32>}, {pipeline_mode = #tpu.pipeline_mode<synchronous>, transform_indices = @transform_11, window_bounds = array<i64: 1, 32>}, {pipeline_mode = #tpu.pipeline_mode<synchronous>, transform_indices = @transform_12, window_bounds = array<i64: 1, 32>}, {pipeline_mode = #tpu.pipeline_mode<synchronous>, transform_indices = @transform_13, window_bounds = array<i64: 1, 32>}, {transform_indices = @transform_14, window_bounds = array<i64: 8, 32>}]} {
    %c0 = arith.constant 0 : index
    %c0_0 = arith.constant 0 : index
    %0 = vector.load %arg1[%c0, %c0_0] : memref<8x32xf32, #tpu.memory_space<vmem>>, vector<8x32xf32>
    %c0_1 = arith.constant 0 : index
    %c0_2 = arith.constant 0 : index
    %c0_3 = arith.constant 0 : index
    %1 = vector.load %arg2[%c0_1, %c0_2, %c0_3] : memref<1x1x8xf32, #tpu.memory_space<vmem>>, vector<1x1x8xf32>
    %2 = vector.shape_cast %1 : vector<1x1x8xf32> to vector<1x8xf32>
    %3 = arith.truncf %0 : vector<8x32xf32> to vector<8x32xbf16>
    %c0_4 = arith.constant 0 : index
    %c0_5 = arith.constant 0 : index
    %4 = vector.load %arg3[%c0_4, %c0_5] : memref<32x96xbf16, #tpu.memory_space<vmem>>, vector<32x96xbf16>
    %cst = arith.constant dense<0.000000e+00> : vector<8x96xf32>
    %5 = tpu.matmul %3, %4, %cst {dimension_numbers = #tpu.dot_dimension_numbers<[1], [0], [0], [1], [0, 0, 1, 1], [], []>} : vector<8x32xbf16>, vector<32x96xbf16>, vector<8x96xf32> -> vector<8x96xf32>
    %c0_6 = arith.constant 0 : index
    %c0_7 = arith.constant 0 : index
    %6 = vector.load %arg4[%c0_6, %c0_7] : memref<1x96xf32, #tpu.memory_space<vmem>>, vector<1x96xf32>
    %7 = vector.broadcast %6 : vector<1x96xf32> to vector<8x96xf32>
    %8 = arith.addf %5, %7 : vector<8x96xf32>
    %c0_8 = arith.constant 0 : index
    %c0_9 = arith.constant 0 : index
    %9 = vector.load %arg5[%c0_8, %c0_9] : memref<32x32xbf16, #tpu.memory_space<vmem>>, vector<32x32xbf16>
    %cst_10 = arith.constant 0.000000e+00 : f32
    %10 = vector.broadcast %cst_10 : f32 to vector<8x32xf32>
    %11 = vector.extract_strided_slice %8 {offsets = [0, 0], sizes = [8, 16], strides = [1, 1]} : vector<8x96xf32> to vector<8x16xf32>
    %12 = arith.truncf %11 : vector<8x16xf32> to vector<8x16xbf16>
    %13 = vector.extract_strided_slice %8 {offsets = [0, 32], sizes = [8, 16], strides = [1, 1]} : vector<8x96xf32> to vector<8x16xf32>
    %14 = arith.truncf %13 : vector<8x16xf32> to vector<8x16xbf16>
    %15 = vector.extract_strided_slice %8 {offsets = [0, 64], sizes = [8, 16], strides = [1, 1]} : vector<8x96xf32> to vector<8x16xf32>
    %16 = arith.truncf %15 : vector<8x16xf32> to vector<8x16xbf16>
    %cst_11 = arith.constant dense<0.000000e+00> : vector<8x8xf32>
    %17 = tpu.matmul %12, %14, %cst_11 {dimension_numbers = #tpu.dot_dimension_numbers<[1], [1], [0], [0], [0, 0, 1, 0], [], []>} : vector<8x16xbf16>, vector<8x16xbf16>, vector<8x8xf32> -> vector<8x8xf32>
    %18 = vector.broadcast %2 : vector<1x8xf32> to vector<8x8xf32>
    %19 = arith.addf %17, %18 : vector<8x8xf32>
    %cst_12 = arith.constant dense<0xFF800000> : vector<8xf32>
    %20 = vector.multi_reduction <maximumf>, %19, %cst_12 [1] : vector<8x8xf32> to vector<8xf32>
    %21 = vector.shape_cast %20 : vector<8xf32> to vector<8x1xf32>
    %22 = vector.broadcast %21 : vector<8x1xf32> to vector<8x8xf32>
    %23 = arith.subf %19, %22 : vector<8x8xf32>
    %24 = math.exp %23 : vector<8x8xf32>
    %cst_13 = arith.constant dense<0.000000e+00> : vector<8xf32>
    %25 = vector.multi_reduction <add>, %24, %cst_13 [1] : vector<8x8xf32> to vector<8xf32>
    %26 = vector.shape_cast %25 : vector<8xf32> to vector<8x1xf32>
    %27 = tpu.reciprocal %26 {approx = true} : vector<8x1xf32> -> vector<8x1xf32>
    %28 = vector.broadcast %27 : vector<8x1xf32> to vector<8x8xf32>
    %29 = arith.mulf %24, %28 : vector<8x8xf32>
    %30 = arith.truncf %29 : vector<8x8xf32> to vector<8x8xbf16>
    %cst_14 = arith.constant dense<0.000000e+00> : vector<8x16xf32>
    %31 = tpu.matmul %30, %16, %cst_14 {dimension_numbers = #tpu.dot_dimension_numbers<[1], [0], [0], [1], [0, 0, 1, 1], [], []>} : vector<8x8xbf16>, vector<8x16xbf16>, vector<8x16xf32> -> vector<8x16xf32>
    %32 = arith.truncf %31 : vector<8x16xf32> to vector<8x16xbf16>
    %33 = vector.extract_strided_slice %9 {offsets = [0, 0], sizes = [16, 32], strides = [1, 1]} : vector<32x32xbf16> to vector<16x32xbf16>
    %cst_15 = arith.constant dense<0.000000e+00> : vector<8x32xf32>
    %34 = tpu.matmul %32, %33, %cst_15 {dimension_numbers = #tpu.dot_dimension_numbers<[1], [0], [0], [1], [0, 0, 1, 1], [], []>} : vector<8x16xbf16>, vector<16x32xbf16>, vector<8x32xf32> -> vector<8x32xf32>
    %35 = arith.addf %10, %34 : vector<8x32xf32>
    %36 = vector.extract_strided_slice %8 {offsets = [0, 16], sizes = [8, 16], strides = [1, 1]} : vector<8x96xf32> to vector<8x16xf32>
    %37 = arith.truncf %36 : vector<8x16xf32> to vector<8x16xbf16>
    %38 = vector.extract_strided_slice %8 {offsets = [0, 48], sizes = [8, 16], strides = [1, 1]} : vector<8x96xf32> to vector<8x16xf32>
    %39 = arith.truncf %38 : vector<8x16xf32> to vector<8x16xbf16>
    %40 = vector.extract_strided_slice %8 {offsets = [0, 80], sizes = [8, 16], strides = [1, 1]} : vector<8x96xf32> to vector<8x16xf32>
    %41 = arith.truncf %40 : vector<8x16xf32> to vector<8x16xbf16>
    %cst_16 = arith.constant dense<0.000000e+00> : vector<8x8xf32>
    %42 = tpu.matmul %37, %39, %cst_16 {dimension_numbers = #tpu.dot_dimension_numbers<[1], [1], [0], [0], [0, 0, 1, 0], [], []>} : vector<8x16xbf16>, vector<8x16xbf16>, vector<8x8xf32> -> vector<8x8xf32>
    %43 = vector.broadcast %2 : vector<1x8xf32> to vector<8x8xf32>
    %44 = arith.addf %42, %43 : vector<8x8xf32>
    %cst_17 = arith.constant dense<0xFF800000> : vector<8xf32>
    %45 = vector.multi_reduction <maximumf>, %44, %cst_17 [1] : vector<8x8xf32> to vector<8xf32>
    %46 = vector.shape_cast %45 : vector<8xf32> to vector<8x1xf32>
    %47 = vector.broadcast %46 : vector<8x1xf32> to vector<8x8xf32>
    %48 = arith.subf %44, %47 : vector<8x8xf32>
    %49 = math.exp %48 : vector<8x8xf32>
    %cst_18 = arith.constant dense<0.000000e+00> : vector<8xf32>
    %50 = vector.multi_reduction <add>, %49, %cst_18 [1] : vector<8x8xf32> to vector<8xf32>
    %51 = vector.shape_cast %50 : vector<8xf32> to vector<8x1xf32>
    %52 = tpu.reciprocal %51 {approx = true} : vector<8x1xf32> -> vector<8x1xf32>
    %53 = vector.broadcast %52 : vector<8x1xf32> to vector<8x8xf32>
    %54 = arith.mulf %49, %53 : vector<8x8xf32>
    %55 = arith.truncf %54 : vector<8x8xf32> to vector<8x8xbf16>
    %cst_19 = arith.constant dense<0.000000e+00> : vector<8x16xf32>
    %56 = tpu.matmul %55, %41, %cst_19 {dimension_numbers = #tpu.dot_dimension_numbers<[1], [0], [0], [1], [0, 0, 1, 1], [], []>} : vector<8x8xbf16>, vector<8x16xbf16>, vector<8x16xf32> -> vector<8x16xf32>
    %57 = arith.truncf %56 : vector<8x16xf32> to vector<8x16xbf16>
    %58 = vector.extract_strided_slice %9 {offsets = [16, 0], sizes = [16, 32], strides = [1, 1]} : vector<32x32xbf16> to vector<16x32xbf16>
    %cst_20 = arith.constant dense<0.000000e+00> : vector<8x32xf32>
    %59 = tpu.matmul %57, %58, %cst_20 {dimension_numbers = #tpu.dot_dimension_numbers<[1], [0], [0], [1], [0, 0, 1, 1], [], []>} : vector<8x16xbf16>, vector<16x32xbf16>, vector<8x32xf32> -> vector<8x32xf32>
    %60 = arith.addf %35, %59 : vector<8x32xf32>
    %c0_21 = arith.constant 0 : index
    %c0_22 = arith.constant 0 : index
    %61 = vector.load %arg6[%c0_21, %c0_22] : memref<1x32xf32, #tpu.memory_space<vmem>>, vector<1x32xf32>
    %62 = vector.broadcast %61 : vector<1x32xf32> to vector<8x32xf32>
    %63 = arith.addf %60, %62 : vector<8x32xf32>
    %64 = arith.addf %63, %0 : vector<8x32xf32>
    %c0_23 = arith.constant 0 : index
    %c0_24 = arith.constant 0 : index
    %65 = vector.load %arg7[%c0_23, %c0_24] : memref<1x32xf32, #tpu.memory_space<vmem>>, vector<1x32xf32>
    %c0_25 = arith.constant 0 : index
    %c0_26 = arith.constant 0 : index
    %66 = vector.load %arg8[%c0_25, %c0_26] : memref<1x32xf32, #tpu.memory_space<vmem>>, vector<1x32xf32>
    %cst_27 = arith.constant dense<0.000000e+00> : vector<8xf32>
    %67 = vector.multi_reduction <add>, %64, %cst_27 [1] : vector<8x32xf32> to vector<8xf32>
    %68 = vector.shape_cast %67 : vector<8xf32> to vector<8x1xf32>
    %cst_28 = arith.constant 3.200000e+01 : f32
    %69 = vector.broadcast %cst_28 : f32 to vector<8x1xf32>
    %70 = arith.divf %68, %69 : vector<8x1xf32>
    %71 = vector.broadcast %70 : vector<8x1xf32> to vector<8x32xf32>
    %72 = arith.subf %64, %71 : vector<8x32xf32>
    %73 = arith.mulf %72, %72 : vector<8x32xf32>
    %cst_29 = arith.constant dense<0.000000e+00> : vector<8xf32>
    %74 = vector.multi_reduction <add>, %73, %cst_29 [1] : vector<8x32xf32> to vector<8xf32>
    %75 = vector.shape_cast %74 : vector<8xf32> to vector<8x1xf32>
    %cst_30 = arith.constant 3.200000e+01 : f32
    %76 = vector.broadcast %cst_30 : f32 to vector<8x1xf32>
    %77 = arith.divf %75, %76 : vector<8x1xf32>
    %cst_31 = arith.constant 9.99999996E-13 : f32
    %78 = vector.broadcast %cst_31 : f32 to vector<8x1xf32>
    %79 = arith.addf %77, %78 : vector<8x1xf32>
    %80 = math.rsqrt %79 : vector<8x1xf32>
    %81 = vector.broadcast %80 : vector<8x1xf32> to vector<8x32xf32>
    %82 = arith.mulf %72, %81 : vector<8x32xf32>
    %83 = vector.broadcast %65 : vector<1x32xf32> to vector<8x32xf32>
    %84 = arith.mulf %82, %83 : vector<8x32xf32>
    %85 = vector.broadcast %66 : vector<1x32xf32> to vector<8x32xf32>
    %86 = arith.addf %84, %85 : vector<8x32xf32>
    %87 = arith.truncf %86 : vector<8x32xf32> to vector<8x32xbf16>
    %c0_32 = arith.constant 0 : index
    %c0_33 = arith.constant 0 : index
    %88 = vector.load %arg9[%c0_32, %c0_33] : memref<32x64xbf16, #tpu.memory_space<vmem>>, vector<32x64xbf16>
    %cst_34 = arith.constant dense<0.000000e+00> : vector<8x64xf32>
    %89 = tpu.matmul %87, %88, %cst_34 {dimension_numbers = #tpu.dot_dimension_numbers<[1], [0], [0], [1], [0, 0, 1, 1], [], []>} : vector<8x32xbf16>, vector<32x64xbf16>, vector<8x64xf32> -> vector<8x64xf32>
    %c0_35 = arith.constant 0 : index
    %c0_36 = arith.constant 0 : index
    %90 = vector.load %arg10[%c0_35, %c0_36] : memref<1x64xf32, #tpu.memory_space<vmem>>, vector<1x64xf32>
    %91 = vector.broadcast %90 : vector<1x64xf32> to vector<8x64xf32>
    %92 = arith.addf %89, %91 : vector<8x64xf32>
    %cst_37 = arith.constant 5.000000e-01 : f32
    %93 = vector.broadcast %cst_37 : f32 to vector<8x64xf32>
    %94 = arith.mulf %93, %92 : vector<8x64xf32>
    %cst_38 = arith.constant 4.471500e-02 : f32
    %95 = vector.broadcast %cst_38 : f32 to vector<8x64xf32>
    %96 = arith.mulf %95, %92 : vector<8x64xf32>
    %97 = arith.mulf %96, %92 : vector<8x64xf32>
    %98 = arith.mulf %97, %92 : vector<8x64xf32>
    %99 = arith.addf %92, %98 : vector<8x64xf32>
    %cst_39 = arith.constant 0.797884583 : f32
    %100 = vector.broadcast %cst_39 : f32 to vector<8x64xf32>
    %101 = arith.mulf %100, %99 : vector<8x64xf32>
    %102 = math.tanh %101 : vector<8x64xf32>
    %cst_40 = arith.constant 1.000000e+00 : f32
    %103 = vector.broadcast %cst_40 : f32 to vector<8x64xf32>
    %104 = arith.addf %103, %102 : vector<8x64xf32>
    %105 = arith.mulf %94, %104 : vector<8x64xf32>
    %106 = arith.truncf %105 : vector<8x64xf32> to vector<8x64xbf16>
    %c0_41 = arith.constant 0 : index
    %c0_42 = arith.constant 0 : index
    %107 = vector.load %arg11[%c0_41, %c0_42] : memref<64x32xbf16, #tpu.memory_space<vmem>>, vector<64x32xbf16>
    %cst_43 = arith.constant dense<0.000000e+00> : vector<8x32xf32>
    %108 = tpu.matmul %106, %107, %cst_43 {dimension_numbers = #tpu.dot_dimension_numbers<[1], [0], [0], [1], [0, 0, 1, 1], [], []>} : vector<8x64xbf16>, vector<64x32xbf16>, vector<8x32xf32> -> vector<8x32xf32>
    %c0_44 = arith.constant 0 : index
    %c0_45 = arith.constant 0 : index
    %109 = vector.load %arg12[%c0_44, %c0_45] : memref<1x32xf32, #tpu.memory_space<vmem>>, vector<1x32xf32>
    %110 = vector.broadcast %109 : vector<1x32xf32> to vector<8x32xf32>
    %111 = arith.addf %108, %110 : vector<8x32xf32>
    %112 = arith.addf %111, %86 : vector<8x32xf32>
    %c0_46 = arith.constant 0 : index
    %c0_47 = arith.constant 0 : index
    %113 = vector.load %arg13[%c0_46, %c0_47] : memref<1x32xf32, #tpu.memory_space<vmem>>, vector<1x32xf32>
    %c0_48 = arith.constant 0 : index
    %c0_49 = arith.constant 0 : index
    %114 = vector.load %arg14[%c0_48, %c0_49] : memref<1x32xf32, #tpu.memory_space<vmem>>, vector<1x32xf32>
    %cst_50 = arith.constant dense<0.000000e+00> : vector<8xf32>
    %115 = vector.multi_reduction <add>, %112, %cst_50 [1] : vector<8x32xf32> to vector<8xf32>
    %116 = vector.shape_cast %115 : vector<8xf32> to vector<8x1xf32>
    %cst_51 = arith.constant 3.200000e+01 : f32
    %117 = vector.broadcast %cst_51 : f32 to vector<8x1xf32>
    %118 = arith.divf %116, %117 : vector<8x1xf32>
    %119 = vector.broadcast %118 : vector<8x1xf32> to vector<8x32xf32>
    %120 = arith.subf %112, %119 : vector<8x32xf32>
    %121 = arith.mulf %120, %120 : vector<8x32xf32>
    %cst_52 = arith.constant dense<0.000000e+00> : vector<8xf32>
    %122 = vector.multi_reduction <add>, %121, %cst_52 [1] : vector<8x32xf32> to vector<8xf32>
    %123 = vector.shape_cast %122 : vector<8xf32> to vector<8x1xf32>
    %cst_53 = arith.constant 3.200000e+01 : f32
    %124 = vector.broadcast %cst_53 : f32 to vector<8x1xf32>
    %125 = arith.divf %123, %124 : vector<8x1xf32>
    %cst_54 = arith.constant 9.99999996E-13 : f32
    %126 = vector.broadcast %cst_54 : f32 to vector<8x1xf32>
    %127 = arith.addf %125, %126 : vector<8x1xf32>
    %128 = math.rsqrt %127 : vector<8x1xf32>
    %129 = vector.broadcast %128 : vector<8x1xf32> to vector<8x32xf32>
    %130 = arith.mulf %120, %129 : vector<8x32xf32>
    %131 = vector.broadcast %113 : vector<1x32xf32> to vector<8x32xf32>
    %132 = arith.mulf %130, %131 : vector<8x32xf32>
    %133 = vector.broadcast %114 : vector<1x32xf32> to vector<8x32xf32>
    %134 = arith.addf %132, %133 : vector<8x32xf32>
    %c0_55 = arith.constant 0 : index
    %c0_56 = arith.constant 0 : index
    %135 = vector.load %arg15[%c0_55, %c0_56] : memref<8x32xf32, #tpu.memory_space<vmem>>, vector<8x32xf32>
    tpu.vector_store %arg15[%c0_55, %c0_56], %134 {strides = array<i32>} : memref<8x32xf32, #tpu.memory_space<vmem>>, vector<8x32xf32>,
    return
  }
  func.func @transform_0(%arg0: i32) -> (i32, i32) {
    %c0_i32 = arith.constant 0 : i32
    %c0_i32_0 = arith.constant 0 : i32
    return %arg0, %c0_i32 : i32, i32
  }
  func.func @transform_1(%arg0: i32) -> (i32, i32, i32) {
    %c0_i32 = arith.constant 0 : i32
    %c0_i32_0 = arith.constant 0 : i32
    %c0_i32_1 = arith.constant 0 : i32
    return %arg0, %c0_i32, %c0_i32_0 : i32, i32, i32
  }
  func.func @transform_2(%arg0: i32) -> (i32, i32) {
    %c0_i32 = arith.constant 0 : i32
    %c0_i32_0 = arith.constant 0 : i32
    %c0_i32_1 = arith.constant 0 : i32
    return %c0_i32, %c0_i32_0 : i32, i32
  }
  func.func @transform_3(%arg0: i32) -> (i32, i32) {
    %c0_i32 = arith.constant 0 : i32
    %c0_i32_0 = arith.constant 0 : i32
    %c0_i32_1 = arith.constant 0 : i32
    return %c0_i32, %c0_i32_0 : i32, i32
  }
  func.func @transform_4(%arg0: i32) -> (i32, i32) {
    %c0_i32 = arith.constant 0 : i32
    %c0_i32_0 = arith.constant 0 : i32
    %c0_i32_1 = arith.constant 0 : i32
    return %c0_i32, %c0_i32_0 : i32, i32
  }
  func.func @transform_5(%arg0: i32) -> (i32, i32) {
    %c0_i32 = arith.constant 0 : i32
    %c0_i32_0 = arith.constant 0 : i32
    %c0_i32_1 = arith.constant 0 : i32
    return %c0_i32, %c0_i32_0 : i32, i32
  }
  func.func @transform_6(%arg0: i32) -> (i32, i32) {
    %c0_i32 = arith.constant 0 : i32
    %c0_i32_0 = arith.constant 0 : i32
    %c0_i32_1 = arith.constant 0 : i32
    return %c0_i32, %c0_i32_0 : i32, i32
  }
  func.func @transform_7(%arg0: i32) -> (i32, i32) {
    %c0_i32 = arith.constant 0 : i32
    %c0_i32_0 = arith.constant 0 : i32
    %c0_i32_1 = arith.constant 0 : i32
    return %c0_i32, %c0_i32_0 : i32, i32
  }
  func.func @transform_8(%arg0: i32) -> (i32, i32) {
    %c0_i32 = arith.constant 0 : i32
    %c0_i32_0 = arith.constant 0 : i32
    %c0_i32_1 = arith.constant 0 : i32
    return %c0_i32, %c0_i32_0 : i32, i32
  }
  func.func @transform_9(%arg0: i32) -> (i32, i32) {
    %c0_i32 = arith.constant 0 : i32
    %c0_i32_0 = arith.constant 0 : i32
    %c0_i32_1 = arith.constant 0 : i32
    return %c0_i32, %c0_i32_0 : i32, i32
  }
  func.func @transform_10(%arg0: i32) -> (i32, i32) {
    %c0_i32 = arith.constant 0 : i32
    %c0_i32_0 = arith.constant 0 : i32
    %c0_i32_1 = arith.constant 0 : i32
    return %c0_i32, %c0_i32_0 : i32, i32
  }
  func.func @transform_11(%arg0: i32) -> (i32, i32) {
    %c0_i32 = arith.constant 0 : i32
    %c0_i32_0 = arith.constant 0 : i32
    %c0_i32_1 = arith.constant 0 : i32
    return %c0_i32, %c0_i32_0 : i32, i32
  }
  func.func @transform_12(%arg0: i32) -> (i32, i32) {
    %c0_i32 = arith.constant 0 : i32
    %c0_i32_0 = arith.constant 0 : i32
    %c0_i32_1 = arith.constant 0 : i32
    return %c0_i32, %c0_i32_0 : i32, i32
  }
  func.func @transform_13(%arg0: i32) -> (i32, i32) {
    %c0_i32 = arith.constant 0 : i32
    %c0_i32_0 = arith.constant 0 : i32
    %c0_i32_1 = arith.constant 0 : i32
    return %c0_i32, %c0_i32_0 : i32, i32
  }
  func.func @transform_14(%arg0: i32) -> (i32, i32) {
    %c0_i32 = arith.constant 0 : i32
    %c0_i32_0 = arith.constant 0 : i32
    return %arg0, %c0_i32 : i32, i32
  }
}

module attributes {stable_mosaic.version = 11 : i64} {
  func.func @_head_kernel(%arg0: i32, %arg1: memref<2x32xf32, #tpu.memory_space<vmem>>, %arg2: memref<32x32xbf16, #tpu.memory_space<vmem>>, %arg3: memref<1x32xf32, #tpu.memory_space<vmem>>, %arg4: memref<32x7xbf16, #tpu.memory_space<vmem>>, %arg5: memref<1x7xf32, #tpu.memory_space<vmem>>, %arg6: memref<2x7xf32, #tpu.memory_space<vmem>>) attributes {dimension_semantics = [#tpu.dimension_semantics<arbitrary>], iteration_bounds = array<i64: 1>, scalar_prefetch = 0 : i64, scratch_operands = 0 : i64, tpu.core_type = #tpu.core_type<tc>, window_params = [{pipeline_mode = #tpu.pipeline_mode<synchronous>, transform_indices = @transform_0, window_bounds = array<i64: 2, 32>}, {pipeline_mode = #tpu.pipeline_mode<synchronous>, transform_indices = @transform_1, window_bounds = array<i64: 32, 32>}, {pipeline_mode = #tpu.pipeline_mode<synchronous>, transform_indices = @transform_2, window_bounds = array<i64: 1, 32>}, {pipeline_mode = #tpu.pipeline_mode<synchronous>, transform_indices = @transform_3, window_bounds = array<i64: 32, 7>}, {pipeline_mode = #tpu.pipeline_mode<synchronous>, transform_indices = @transform_4, window_bounds = array<i64: 1, 7>}, {pipeline_mode = #tpu.pipeline_mode<synchronous>, transform_indices = @transform_5, window_bounds = array<i64: 2, 7>}]} {
    %c0 = arith.constant 0 : index
    %c0_0 = arith.constant 0 : index
    %0 = vector.load %arg1[%c0, %c0_0] : memref<2x32xf32, #tpu.memory_space<vmem>>, vector<2x32xf32>
    %1 = arith.truncf %0 : vector<2x32xf32> to vector<2x32xbf16>
    %c0_1 = arith.constant 0 : index
    %c0_2 = arith.constant 0 : index
    %2 = vector.load %arg2[%c0_1, %c0_2] : memref<32x32xbf16, #tpu.memory_space<vmem>>, vector<32x32xbf16>
    %cst = arith.constant dense<0.000000e+00> : vector<2x32xf32>
    %3 = tpu.matmul %1, %2, %cst {dimension_numbers = #tpu.dot_dimension_numbers<[1], [0], [0], [1], [0, 0, 1, 1], [], []>} : vector<2x32xbf16>, vector<32x32xbf16>, vector<2x32xf32> -> vector<2x32xf32>
    %c0_3 = arith.constant 0 : index
    %c0_4 = arith.constant 0 : index
    %4 = vector.load %arg3[%c0_3, %c0_4] : memref<1x32xf32, #tpu.memory_space<vmem>>, vector<1x32xf32>
    %5 = vector.broadcast %4 : vector<1x32xf32> to vector<2x32xf32>
    %6 = arith.addf %3, %5 : vector<2x32xf32>
    %7 = math.tanh %6 : vector<2x32xf32>
    %8 = arith.truncf %7 : vector<2x32xf32> to vector<2x32xbf16>
    %c0_5 = arith.constant 0 : index
    %c0_6 = arith.constant 0 : index
    %9 = vector.load %arg4[%c0_5, %c0_6] : memref<32x7xbf16, #tpu.memory_space<vmem>>, vector<32x7xbf16>
    %cst_7 = arith.constant dense<0.000000e+00> : vector<2x7xf32>
    %10 = tpu.matmul %8, %9, %cst_7 {dimension_numbers = #tpu.dot_dimension_numbers<[1], [0], [0], [1], [0, 0, 1, 1], [], []>} : vector<2x32xbf16>, vector<32x7xbf16>, vector<2x7xf32> -> vector<2x7xf32>
    %c0_8 = arith.constant 0 : index
    %c0_9 = arith.constant 0 : index
    %11 = vector.load %arg5[%c0_8, %c0_9] : memref<1x7xf32, #tpu.memory_space<vmem>>, vector<1x7xf32>
    %12 = vector.broadcast %11 : vector<1x7xf32> to vector<2x7xf32>
    %13 = arith.addf %10, %12 : vector<2x7xf32>
    %c0_10 = arith.constant 0 : index
    %c0_11 = arith.constant 0 : index
    %14 = vector.load %arg6[%c0_10, %c0_11] : memref<2x7xf32, #tpu.memory_space<vmem>>, vector<2x7xf32>
    tpu.vector_store %arg6[%c0_10, %c0_11], %13 {strides = array<i32>} : memref<2x7xf32, #tpu.memory_space<vmem>>, vector<2x7xf32>,
    return
  }
  func.func @transform_0(%arg0: i32) -> (i32, i32) {
    %c0_i32 = arith.constant 0 : i32
    %c0_i32_0 = arith.constant 0 : i32
    %c0_i32_1 = arith.constant 0 : i32
    return %c0_i32, %c0_i32_0 : i32, i32
  }
  func.func @transform_1(%arg0: i32) -> (i32, i32) {
    %c0_i32 = arith.constant 0 : i32
    %c0_i32_0 = arith.constant 0 : i32
    %c0_i32_1 = arith.constant 0 : i32
    return %c0_i32, %c0_i32_0 : i32, i32
  }
  func.func @transform_2(%arg0: i32) -> (i32, i32) {
    %c0_i32 = arith.constant 0 : i32
    %c0_i32_0 = arith.constant 0 : i32
    %c0_i32_1 = arith.constant 0 : i32
    return %c0_i32, %c0_i32_0 : i32, i32
  }
  func.func @transform_3(%arg0: i32) -> (i32, i32) {
    %c0_i32 = arith.constant 0 : i32
    %c0_i32_0 = arith.constant 0 : i32
    %c0_i32_1 = arith.constant 0 : i32
    return %c0_i32, %c0_i32_0 : i32, i32
  }
  func.func @transform_4(%arg0: i32) -> (i32, i32) {
    %c0_i32 = arith.constant 0 : i32
    %c0_i32_0 = arith.constant 0 : i32
    %c0_i32_1 = arith.constant 0 : i32
    return %c0_i32, %c0_i32_0 : i32, i32
  }
  func.func @transform_5(%arg0: i32) -> (i32, i32) {
    %c0_i32 = arith.constant 0 : i32
    %c0_i32_0 = arith.constant 0 : i32
    %c0_i32_1 = arith.constant 0 : i32
    return %c0_i32, %c0_i32_0 : i32, i32
  }
}

</mosaic_0001>

<bundles_post_ra>
// kernel: bert_classifier_forward.4
= control target key start
LH: loop header
LB: loop body
LE: loop exit
PB: predicated region body
PF: predicated region fallthrough
CT: control target
= control target key end

     0   :  { %vm18_vm0 = vcmask 261120   ;;  %s118_s0 = inlined_call_operand.vmem [shape: f32[16,32], index: 0, kind: input, shape index: {}]   ;;  %s119_s1 = inlined_call_operand.vmem [shape: f32[1,32], index: 1, kind: input, shape index: {}]   ;;  %s120_s2 = inlined_call_operand.vmem [shape: f32[1,32], index: 2, kind: input, shape index: {}]   ;;  %s121_s3 = inlined_call_operand.vmem [shape: f32[16,32], index: 3, kind: output, shape index: {}]  }
   0x1   :  { %v14_v0 = vld [vmem:[%s118_s0] sm:$0xff]  ;;  %v15_v1 = vld [vmem:[%s118_s0 + $0x8] sm:$0xff] }
   0x2   :  { %v19_v2 = vsel %vm18_vm0, %v14_v0, 0.0  ;;  %v22_v3 = vsel %vm18_vm0, %v15_v1, 0.0  ;;  %v68_v21 = vld [vmem:[%s119_s1] ss:$0 sm:$0xff] }
   0x3   :  { %20 = vadd.xlane.f32.xlu0 %v19_v2  ;;  %v69_v23 = vld [vmem:[%s120_s2] ss:$0 sm:$0xff] }
   0x7   :  { %23 = vadd.xlane.f32.xlu0 %v22_v3 }
  0x90   :  { %v21_v4 = vpop.xlane.xlu0 %20 }
  0x91   :  { %v26_v5 = vmul.f32 0.03125, %v21_v4 }
  0x93   :  { %v28_v6 = vsub.f32 %v14_v0, %v26_v5 }
  0x94   :  { %v24_v7 = vpop.xlane.xlu0 %23 }
  0x95   :  { %v27_v8 = vmul.f32 0.03125, %v24_v7  ;;  %v30_v9 = vmul.f32 %v28_v6, %v28_v6 }
  0x97   :  { %v29_v10 = vsub.f32 %v15_v1, %v27_v8  ;;  %v32_v11 = vsel %vm18_vm0, %v30_v9, 0.0 }
  0x98   :  { %33 = vadd.xlane.f32.xlu1 %v32_v11 }
  0x99   :  { %v31_v12 = vmul.f32 %v29_v10, %v29_v10 }
  0x9b   :  { %v35_v13 = vsel %vm18_vm0, %v31_v12, 0.0 }
  0x9c   :  { %36 = vadd.xlane.f32.xlu1 %v35_v13 }
 0x125   :  { %v34_v14 = vpop.xlane.xlu1 %33 }
 0x126   :  { %v38_v15 = vmul.f32 0.03125, %v34_v14 }
 0x128   :  { %v40_v16 = vadd.f32 1e-12, %v38_v15 }
 0x129   :  { %v37_v17 = vpop.xlane.xlu1 %36 }
 0x12a   :  { %70 = vrsqrt.f32 %v40_v16  ;;  %v39_v18 = vmul.f32 0.03125, %v37_v17 }
 0x12c   :  { %v41_v19 = vadd.f32 1e-12, %v39_v18 }
 0x12e   :  { %72 = vrsqrt.f32 %v41_v19 }
 0x134   :  { %v71_v20 = vpop.eup %70 }
 0x135   :  { %v44_v22 = vmul.f32 %v71_v20, %v28_v6 }
 0x137   :  { %v52_v24 = vmul.f32 %v68_v21, %v44_v22 }
 0x138   :  { %v73_v25 = vpop.eup %72 }
 0x139   :  { %v60_v26 = vadd.f32 %v69_v23, %v52_v24  ;;  %v45_v27 = vmul.f32 %v73_v25, %v29_v10 }
 0x13b   :  { %62 = vst.msk [vmem:[%s121_s3] sm:$0xff] %vm18_vm0, %v60_v26  ;;  %v53_v28 = vmul.f32 %v68_v21, %v45_v27 }
 0x13d   :  { %v61_v29 = vadd.f32 %v69_v23, %v53_v28 }
 0x13f   :  { %63 = vst.msk [vmem:[%s121_s3 + $0x8] sm:$0xff] %vm18_vm0, %v61_v29 }

// kernel: bert_classifier_forward.7
= control target key start
LH: loop header
LB: loop body
LE: loop exit
PB: predicated region body
PF: predicated region fallthrough
CT: control target
= control target key end

     0   :  { %v238_v1 = vmov 0.0   ;;  %vm239_vm0 = vmmov 0   ;;  %s306_s0 = inlined_call_operand.vmem [shape: f32[2,32], index: 0, kind: input, shape index: {}]   ;;  %s307_s1 = inlined_call_operand.vmem [shape: bf16[32,32], index: 1, kind: input, shape index: {}]   ;;  %s308_s2 = inlined_call_operand.vmem [shape: f32[1,32], index: 2, kind: input, shape index: {}]   ;;  %s309_s3 = inlined_call_operand.vmem [shape: bf16[32,7], index: 3, kind: input, shape index: {}]   ;;  %s310_s4 = inlined_call_operand.vmem [shape: f32[1,7], index: 4, kind: input, shape index: {}]   ;;  %s311_s5 = inlined_call_operand.hbm [shape: f32[2,7], index: 5, kind: output, shape index: {}]  }
   0x1   :  { %v208_v0 = vld [vmem:[%s307_s1] sm:$0xff]   ;;  %189 = vmatprep.subr.bf16.mxu0 %v238_v1  ;;  %197 = vmatprep.subr.bf16.mxu1 %v238_v1  ;;  %v209_v2 = vld [vmem:[%s307_s1 + $0x8] sm:$0xff]  }
   0x2   :  { %190 = vmatpush3.bf16.msra.mxu0 %v208_v0  ;;  %193 = vmatprep.mubr.msk.bf16.mxu0 %vm239_vm0, %v238_v1  ;;  %v22_v3 = vld [vmem:[%s306_s0] sm:$0x3] }
   0x3   :  { %191 = vmatprep.subr.bf16.mxu0 %v238_v1  ;;  %201 = vmatprep.mubr.msk.bf16.mxu1 %vm239_vm0, %v238_v1 }
   0x4   :  { %10 = vsyncpa [#allocation3], 0  ;;  %v23_v4 = vpack.c.bf16 %v22_v3, %v22_v3  ;;  %vm47_vm1 = vcmask 261120   ;;  %v210_v5 = vld [vmem:[%s309_s3] sm:$0xff]   ;;  %v211_v6 = vld [vmem:[%s309_s3 + $0x8] sm:$0xff]   ;;  %s240_s3 = smov [#allocation2]  }
   0x5   :  { %198 = vmatpush3.bf16.msra.mxu1 %v210_v5  ;;  %v175_v7 = vld [vmem:[%s308_s2] ss:$0 sm:$0xff]  ;;  %s167_s30 = sshll.u32 %s240_s3, 4  ;;  %vm159_vm2 = vcmask 50176   ;;  %s168_s30 = int_to_ptr.vmem [resolvable:$true] %s167_s30 }
   0x6   :  { %192 = vmatpush3.bf16.msra.mxu0 %v209_v2  ;;  %199 = vmatprep.subr.bf16.mxu1 %v238_v1  ;;  %v179_v15 = vld [vmem:[%s310_s4] ss:$0 sm:$0xff]  ;;  %s214_s2 = scalar_lea.vmem %s168_s30, 32  ;;  %p219_p1 = scmp.lt.s32.totalorder %s168_s30, %s168_s30 }
   0x7   :  { %p215_p0 = scmp.ne.s32.totalorder %s168_s30, %s214_s2  ;;  %p220_p2 = scmp.lt.s32.totalorder %s214_s2, %s214_s2 }
   0x9   :  { %194 = vmatmul.mubr.msk.bf16.vlgmr.msra.gmra.mrb[0].mxu0 %vm47_vm1, %v23_v4  ;;  %200 = vmatpush3.bf16.msra.mxu1 %v211_v6  ;;  %p221_p3 = por %p220_p2, %p219_p1 }
   0xb   :  { %p222_p4 = pnand %p221_p3, %p215_p0 }
  0xdc   :  { %v85_v8 = vpop.f32.mrb[0].mxu0 }
  0xdd   :  { %v86_v9 = vadd.f32 %v175_v7, %v85_v8  ;;  %v195_v10 = vpop.f32.mrb[1].mxu0 }
  0xde   :  { %v88_v11 = vpop.f32.mrb[2].mxu0 }
  0xdf   :  { %212 = vtanh.f32 %v86_v9  ;;  %v196_v12 = vpop.f32.mrb[3].mxu0 }
  0xe9   :  { %v213_v13 = vpop.eup %212 }
  0xea   :  { %v92_v14 = vpack.c.bf16 %v213_v13, %v213_v13 }
  0xec   :  { %202 = vmatmul.mubr.msk.bf16.vlgmr.msra.gmra.mrb[0].mxu1 %vm47_vm1, %v92_v14 }
 0x1bf   :  { %v153_v16 = vpop.f32.mrb[0].mxu1 }
 0x1c0   :  { %v154_v17 = vadd.f32 %v179_v15, %v153_v16  ;;  %v203_v18 = vpop.f32.mrb[1].mxu1 }
 0x1c1   :  { %v156_v19 = vpop.f32.mrb[2].mxu1 }
 0x1c2   :  { %v204_v20 = vpop.f32.mrb[3].mxu1  ;;  %160 = vst.msk [vmem:[#allocation2] sm:$0x3] %vm159_vm2, %v154_v17 }
 0x1c3   :  { %225 = shalt.err (!%p222_p4)
}
 0x1c4   :  { %s226_s4 = scalar_lea.hbm %s311_s5, 32 }
 0x1c5   :  { %p227_p5 = scmp.ne.s32.totalorder %s311_s5, %s226_s4  ;;  %p230_p6 = scmp.lt.u32.totalorder %s226_s4, %s311_s5 }
 0x1c7   :  { %p232_p7 = pnand %p230_p6, %p227_p5 }
 0x1c9   :  { %235 = shalt.err (!%p232_p7)
}
 0x1ca   :  { %170 = dma.vmem_to_hbm [thread:$0]  %s168_s30, 32, %s311_s5, [#allocation3]  }
 0x1cb   :  { %236 = dma.done.wait [#allocation3], 32  }
 0x1cc   :  { %237 = vsyncadd [#allocation3], 4294967264 }
 0x1cd   :  { %174 = vsyncpa [#allocation3], 1 }

// kernel: bert_classifier_forward.5
= control target key start
LH: loop header
LB: loop body
LE: loop exit
PB: predicated region body
PF: predicated region fallthrough
CT: control target
= control target key end

     0   :  { %s1426_s29 = smov 0   ;;  %s1564_s0 = inlined_call_operand.vmem [shape: f32[16,32], index: 0, kind: input, shape index: {}]   ;;  %s1565_s1 = inlined_call_operand.vmem [shape: f32[2,1,8], index: 1, kind: input, shape index: {}]   ;;  %s1566_s2 = inlined_call_operand.vmem [shape: bf16[32,96], index: 2, kind: input, shape index: {}]   ;;  %s1567_s3 = inlined_call_operand.vmem [shape: f32[1,96], index: 3, kind: input, shape index: {}]   ;;  %s1568_s4 = inlined_call_operand.vmem [shape: bf16[32,32], index: 4, kind: input, shape index: {}]   ;;  %s1569_s5 = inlined_call_operand.vmem [shape: f32[1,32], index: 5, kind: input, shape index: {}]   ;;  %s1570_s6 = inlined_call_operand.vmem [shape: f32[1,32], index: 6, kind: input, shape index: {}]   ;;  %s1571_s7 = inlined_call_operand.vmem [shape: f32[1,32], index: 7, kind: input, shape index: {}]   ;;  %s1572_s8 = inlined_call_operand.vmem [shape: bf16[32,64], index: 8, kind: input, shape index: {}]   ;;  %s1573_s9 = inlined_call_operand.vmem [shape: f32[1,64], index: 9, kind: input, shape index: {}]   ;;  %s1574_s10 = inlined_call_operand.vmem [shape: bf16[64,32], index: 10, kind: input, shape index: {}]   ;;  %s1575_s11 = inlined_call_operand.vmem [shape: f32[1,32], index: 11, kind: input, shape index: {}]   ;;  %s1576_s12 = inlined_call_operand.vmem [shape: f32[1,32], index: 12, kind: input, shape index: {}]   ;;  %s1577_s13 = inlined_call_operand.vmem [shape: f32[1,32], index: 13, kind: input, shape index: {}]   ;;  %s1578_s14 = inlined_call_operand.vmem [shape: f32[16,32], index: 14, kind: output, shape index: {}]  }
   0x1 LB: > { %s1173_s30 = sadd.s32 4294967295, %s1342_s29   ;;  %p1177_p0 = scmp.ge.s32.totalorder %s1342_s29, 1  ;;  %s1342_s29 = sphi %s1426_s29, %s24_s29  }
   0x2   : > { %p419_p1 = scmp.lt.s32.totalorder %s1342_s29, 3 }
   0x4   : > { %p420_p2 = pnand %p1177_p0, %p419_p1 }
   0x5   : > { %v1312_v0 = vld [vmem:[%s1566_s2] sm:$0xff] (!%p420_p2)   ;;  %v1344_v1 = vmov (!%p420_p2), 0.0   ;;  %v1313_v2 = vld [vmem:[%s1566_s2 + $0x8] sm:$0xff] (!%p420_p2)   ;;  %vm1345_vm0 = vmmov (!%p420_p2), 0   ;;  %p466_p3 = scmp.lt.s32.totalorder (!%p420_p2), %s1173_s30, 1  ;;  %vm504_vm1 = vcmask (!%p420_p2), 261120  }
   0x6   : > { %423 = sbr.rel (%p420_p2) target bundleno = 2414 (0x96e), region = 76  ;;  %1233 = vmatprep.subr.bf16.mxu1 (!%p420_p2), %v1344_v1  ;;  %1247 = vmatprep.subr.bf16.mxu0 (!%p420_p2), %v1344_v1  ;;  %v1180_v5 = vld [vmem:[%s1567_s3] ss:$0 sm:$0xff] (!%p420_p2)  ;;  %s1346_s25 = smov (!%p420_p2), 112   ;;  %vm562_vm2 = vcmask (!%p420_p2), 130048   ;;  %vm609_vm3 = vcmask (!%p420_p2), 64512  }
   0x7   : > { %1234 = vmatpush3.bf16.msra.mxu1 (!%p420_p2), %v1312_v0  ;;  %1237 = vmatprep.mubr.msk.bf16.mxu1 (!%p420_p2), %vm1345_vm0, %v1344_v1  ;;  %s1347_s26 = smov (!%p420_p2), 96   ;;  %s1348_s27 = smov (!%p420_p2), 80   ;;  %vm627_vm4 = vcmask (!%p420_p2), 1043456   ;;  %v1314_v52 = vld [vmem:[%s1568_s4] sm:$0xff] (!%p420_p2)   ;;  %v1315_v53 = vld [vmem:[%s1568_s4 + $0x8] sm:$0xff] (!%p420_p2)   ;;  %vm1036_vm5 = vcmask (!%p420_p2), 523264  }
   0x8   : > { %1235 = vmatprep.subr.bf16.mxu1 (!%p420_p2), %v1344_v1  ;;  %1249 = vmatprep.mubr.msk.bf16.mxu0 (!%p420_p2), %vm1345_vm0, %v1344_v1  ;;  %s1349_s17 = smov (!%p420_p2), 64   ;;  %s1350_s18 = smov (!%p420_p2), 48  }
   0xb   : > { %1236 = vmatpush3.bf16.msra.mxu1 (!%p420_p2), %v1313_v2 }
   0xc   : > { %1241 = vmatprep.subr.bf16.mxu1 (!%p420_p2), %v1344_v1 }
   0xd   : > { %s1580_s30 = smov (!%p466_p3, %s1173_s30), 1 }
   0xe   : > { %s1178_s19 = sshll.u32 %s1580_s30, 3  ;;  %s472_s16 = scalar_lea.vmem %s1565_s1, %s1580_s30 }
   0xf   : > { %s469_s22 = scalar_lea.vmem %s1564_s0, %s1178_s19  ;;  %v1184_v17 = vld [vmem:[%s472_s16] ss:$0 sm:$0xff] }
  0x10   : > { %v1456_v3 = vld [vmem:[%s469_s22] sm:$0xff] }
  0x11   : > { %v480_v4 = vpack.c.bf16 %v1456_v3, %v1456_v3 }
  0x13   : > { %1238 = vmatmul.mubr.msk.bf16.vlgmr.msra.gmra.mrb[0].mxu1 %vm504_vm1, %v480_v4 }
  0x14   : > { %1243 = vmatprep.mubr.msk.bf16.mxu1 %vm1345_vm0, %v1344_v1 }
  0xe6   : > { %v542_v6 = vpop.f32.mrb[0].mxu1 }
  0xe7   : > { %v543_v7 = vadd.f32 %v1180_v5, %v542_v6  ;;  %v1239_v8 = vpop.f32.mrb[1].mxu1 }
  0xe8   : > { %v545_v9 = vpop.f32.mrb[2].mxu1 }
  0xe9   : > { %v552_v10 = vpack.c.bf16 %v543_v7, %v543_v7  ;;  %v1240_v11 = vpop.f32.mrb[3].mxu1  ;;  %v1193_v7 = vld [vmem:[%s1569_s5] ss:$0 sm:$0xff] }
  0xeb   : > { %672 = vrot.lane.b32.xlu1 %v552_v10, %s1346_s25  ;;  %560 = vrot.lane.b32.xlu0 %v552_v10, %s1347_s26  ;;  %s476_s26 = scalar_lea.vmem %s1578_s14, %s1178_s19 }
  0xef   : > { %674 = vrot.lane.b32.xlu0 %v552_v10, %s1348_s27 }
 0x15d   : > { %v561_v12 = vpop.permute.xlu0 %560  ;;  %v673_v16 = vpop.permute.xlu1 %672 }
 0x15e   : > { %v567_v13 = vsel %vm562_vm2, %v561_v12, 0 }
 0x15f   : > { %1242 = vmatpush3.bf16.xpose.msra.mxu1 %v567_v13 }
 0x160   : > { %1253 = vmatprep.subr.bf16.mxu1 %v1344_v1 }
 0x161   : > { %v675_v14 = vpop.permute.xlu0 %674 }
 0x162   : > { %v680_v15 = vsel %vm562_vm2, %v675_v14, 0 }
 0x166   : > { %1244 = vmatmul.mubr.msk.bf16.vlgmr.msra.gmra.mrb[4].mxu1 %vm562_vm2, %v552_v10 }
 0x167   : > { %1254 = vmatpush3.bf16.xpose.msra.mxu1 %v680_v15  ;;  %1255 = vmatprep.mubr.msk.bf16.mxu1 %vm1345_vm0, %v1344_v1 }
 0x168   : > { %1265 = vmatprep.subr.bf16.mxu1 %v1344_v1 }
 0x16e   : > { %1256 = vmatmul.mubr.msk.bf16.vlgmr.msra.gmra.mrb[8].mxu1 %vm562_vm2, %v673_v16 }
 0x16f   : > { %1267 = vmatprep.mubr.msk.bf16.mxu1 %vm1345_vm0, %v1344_v1  ;;  %1266 = vmatpush3.bf16.msra.mxu1 %v1315_v53 }
 0x170   : > { %1277 = vmatprep.subr.bf16.mxu1 %v1344_v1 }
 0x239   : > { %v603_v18 = vpop.f32.mrb[4].mxu1 }
 0x23a   : > { %v604_v19 = vadd.f32 %v1184_v17, %v603_v18  ;;  %v1245_v20 = vpop.f32.mrb[5].mxu1 }
 0x23b   : > { %v606_v21 = vpop.f32.mrb[6].mxu1  ;;  %v1316_v20 = vld [vmem:[%s1572_s8] sm:$0xff]  }
 0x23c   : > { %v1246_v22 = vpop.f32.mrb[7].mxu1  ;;  %v610_v23 = vsel %vm609_vm3, %v604_v19, -inf  ;;  %v1317_v21 = vld [vmem:[%s1572_s8 + $0x8] sm:$0xff]  }
 0x23d   : > { %611 = vmax.xlane.f32.xlu1 %v610_v23 }
 0x241   : > { %v716_v24 = vpop.f32.mrb[8].mxu1 }
 0x242   : > { %v717_v25 = vadd.f32 %v1184_v17, %v716_v24  ;;  %v1257_v26 = vpop.f32.mrb[9].mxu1 }
 0x243   : > { %v719_v27 = vpop.f32.mrb[10].mxu1 }
 0x244   : > { %v1258_v28 = vpop.f32.mrb[11].mxu1  ;;  %v722_v29 = vsel %vm609_vm3, %v717_v25, -inf  ;;  %v1195_v27 = vld [vmem:[%s1571_s7] ss:$0 sm:$0xff] }
 0x245   : > { %723 = vmax.xlane.f32.xlu0 %v722_v29 }
 0x2ca   : > { %v612_v30 = vpop.xlane.xlu1 %611 }
 0x2cb   : > { %v613_v31 = vsub.f32 %v604_v19, %v612_v30 }
 0x2cd   : > { %v614_v32 = vmul.f32 1.442695, %v613_v31  ;;  %v1318_v31 = vld [vmem:[%s1574_s10] sm:$0xff]  }
 0x2cf   : > { %1322 = vpow2.f32 %v614_v32  ;;  %v1319_v32 = vld [vmem:[%s1574_s10 + $0x8] sm:$0xff]  }
 0x2d2   : > { %v724_v33 = vpop.xlane.xlu0 %723 }
 0x2d3   : > { %v725_v34 = vsub.f32 %v717_v25, %v724_v33  ;;  %v1194_v25 = vld [vmem:[%s1570_s6] ss:$0 sm:$0xff]  ;;  %v1320_v33 = vld [vmem:[%s1574_s10 + $0x10] sm:$0xff]  }
 0x2d5   : > { %v726_v35 = vmul.f32 1.442695, %v725_v34  ;;  %v1321_v34 = vld [vmem:[%s1574_s10 + $0x18] sm:$0xff]  }
 0x2d7   : > { %1324 = vpow2.f32 %v726_v35  ;;  %v1196_v35 = vld [vmem:[%s1573_s9] ss:$0 sm:$0xff] }
 0x2d9   : > { %v1323_v36 = vpop.eup %1322 }
 0x2da   : > { %v616_v37 = vsel %vm609_vm3, %v1323_v36, 0.0 }
 0x2db   : > { %617 = vadd.xlane.f32.xlu0 %v616_v37 }
 0x2e1   : > { %v1325_v38 = vpop.eup %1324 }
 0x2e2   : > { %v728_v39 = vsel %vm609_vm3, %v1325_v38, 0.0 }
 0x2e3   : > { %729 = vadd.xlane.f32.xlu1 %v728_v39 }
 0x2f1   : > { %622 = vrot.lane.b32.xlu0 %v552_v10, %s1349_s17 }
 0x2f4   : > { %734 = vrot.lane.b32.xlu1 %v552_v10, %s1350_s18 }
 0x368   : > { %v618_v40 = vpop.xlane.xlu0 %617 }
 0x369   : > { %1326 = vrcp.f32 %v618_v40 }
 0x36c   : > { %v623_v41 = vpop.permute.xlu0 %622 }
 0x36d   : > { %v629_v42 = vsel %vm627_vm4, %v623_v41, 0 }
 0x36e   : > { %1248 = vmatpush3.bf16.msra.mxu0 %v629_v42 }
 0x36f   : > { %1259 = vmatprep.subr.bf16.mxu0 %v1344_v1 }
 0x370   : > { %v730_v43 = vpop.xlane.xlu1 %729 }
 0x371   : > { %1328 = vrcp.f32 %v730_v43 }
 0x373   : > { %v1327_v44 = vpop.eup %1326 }
 0x374   : > { %v620_v45 = vmul.f32 %v1327_v44, %v1323_v36  ;;  %v735_v46 = vpop.permute.xlu1 %734 }
 0x375   : > { %v740_v48 = vsel %vm627_vm4, %v735_v46, 0 }
 0x376   : > { %v621_v47 = vpack.c.bf16 %v620_v45, %v620_v45 }
 0x378   : > { %1250 = vmatmul.mubr.msk.bf16.vlgmr.msra.gmra.mrb[0].mxu0 %vm609_vm3, %v621_v47 }
 0x379   : > { %1260 = vmatpush3.bf16.msra.mxu0 %v740_v48  ;;  %1261 = vmatprep.mubr.msk.bf16.mxu0 %vm1345_vm0, %v1344_v1 }
 0x37a   : > { %1271 = vmatprep.subr.bf16.mxu0 %v1344_v1 }
 0x37b   : > { %v1329_v49 = vpop.eup %1328 }
 0x37c   : > { %v732_v50 = vmul.f32 %v1329_v49, %v1325_v38 }
 0x37e   : > { %v733_v51 = vpack.c.bf16 %v732_v50, %v732_v50  ;;  %v1200_v50 = vld [vmem:[%s1575_s11] ss:$0 sm:$0xff] }
 0x380   : > { %1262 = vmatmul.mubr.msk.bf16.vlgmr.msra.gmra.mrb[4].mxu0 %vm609_vm3, %v733_v51 }
 0x381   : > { %1273 = vmatprep.mubr.msk.bf16.mxu0 %vm1345_vm0, %v1344_v1  ;;  %1272 = vmatpush3.bf16.msra.mxu0 %v1314_v52 }
 0x382   : > { %1285 = vmatprep.subr.bf16.mxu0 %v1344_v1 }
 0x44b   : > { %v665_v54 = vpop.f32.mrb[0].mxu0 }
 0x44c   : > { %v671_v55 = vpack.c.bf16 %v665_v54, %v665_v54  ;;  %v1251_v56 = vpop.f32.mrb[1].mxu0 }
 0x44d   : > { %v668_v57 = vpop.f32.mrb[2].mxu0 }
 0x44e   : > { %v1252_v58 = vpop.f32.mrb[3].mxu0  ;;  %1274 = vmatmul.mubr.msk.bf16.vlgmr.msra.gmra.mrb[8].mxu0 %vm562_vm2, %v671_v55 }
 0x44f   : > { %1293 = vmatprep.mubr.msk.bf16.mxu0 %vm1345_vm0, %v1344_v1  ;;  %1286 = vmatpush3.bf16.msra.mxu0 %v1318_v31 }
 0x450   : > { %1287 = vmatprep.subr.bf16.mxu0 %v1344_v1 }
 0x453   : > { %v776_v59 = vpop.f32.mrb[4].mxu0  ;;  %1288 = vmatpush3.bf16.msra.mxu0 %v1319_v32 }
 0x454   : > { %v782_v60 = vpack.c.bf16 %v776_v59, %v776_v59  ;;  %v1263_v61 = vpop.f32.mrb[5].mxu0  ;;  %1289 = vmatprep.subr.bf16.mxu0 %v1344_v1 }
 0x455   : > { %v779_v62 = vpop.f32.mrb[6].mxu0 }
 0x456   : > { %v1264_v63 = vpop.f32.mrb[7].mxu0  ;;  %1268 = vmatmul.mubr.msk.bf16.vlgmr.msra.gmra.mrb[12].mxu1 %vm562_vm2, %v782_v60 }
 0x457   : > { %1281 = vmatprep.mubr.msk.bf16.mxu1 %vm1345_vm0, %v1344_v1  ;;  %1278 = vmatpush3.bf16.msra.mxu1 %v1316_v20 }
 0x458   : > { %1279 = vmatprep.subr.bf16.mxu1 %v1344_v1  ;;  %1290 = vmatpush3.bf16.msra.mxu0 %v1320_v33 }
 0x459   : > { %1291 = vmatprep.subr.bf16.mxu0 %v1344_v1 }
 0x45b   : > { %1280 = vmatpush3.bf16.msra.mxu1 %v1317_v21 }
 0x45c   : > { %1292 = vmatpush3.bf16.msra.mxu0 %v1321_v34 }
 0x521   : > { %v875_v0 = vpop.f32.mrb[8].mxu0 }
 0x522   : > { %v1275_v2 = vpop.f32.mrb[9].mxu0 }
 0x523   : > { %v878_v4 = vpop.f32.mrb[10].mxu0 }
 0x524   : > { %v1276_v5 = vpop.f32.mrb[11].mxu0 }
 0x525   : > { %v1206_v5 = vld [vmem:[%s1576_s12] ss:$0 sm:$0xff] }
 0x529   : > { %v826_v6 = vpop.f32.mrb[12].mxu1 }
 0x52a   : > { %v876_v8 = vadd.f32 %v875_v0, %v826_v6  ;;  %v1269_v9 = vpop.f32.mrb[13].mxu1 }
 0x52b   : > { %v829_v10 = vpop.f32.mrb[14].mxu1 }
 0x52c   : > { %v888_v11 = vadd.f32 %v1193_v7, %v876_v8  ;;  %v1270_v12 = vpop.f32.mrb[15].mxu1  ;;  %v1207_v7 = vld [vmem:[%s1577_s13] ss:$0 sm:$0xff] }
 0x52e   : > { %v889_v13 = vadd.f32 %v888_v11, %v1456_v3 }
 0x530   : > { %v892_v14 = vsel %vm504_vm1, %v889_v13, 0.0 }
 0x531   : > { %893 = vadd.xlane.f32.xlu1 %v892_v14 }
 0x5be   : > { %v894_v15 = vpop.xlane.xlu1 %893 }
 0x5bf   : > { %v896_v16 = vmul.f32 0.03125, %v894_v15 }
 0x5c1   : > { %v897_v17 = vsub.f32 %v889_v13, %v896_v16 }
 0x5c3   : > { %v898_v18 = vmul.f32 %v897_v17, %v897_v17 }
 0x5c5   : > { %v899_v19 = vsel %vm504_vm1, %v898_v18, 0.0 }
 0x5c6   : > { %900 = vadd.xlane.f32.xlu0 %v899_v19 }
 0x653   : > { %v901_v3 = vpop.xlane.xlu0 %900 }
 0x654   : > { %v902_v22 = vmul.f32 0.03125, %v901_v3 }
 0x656   : > { %v903_v23 = vadd.f32 1e-12, %v902_v22 }
 0x658   : > { %1330 = vrsqrt.f32 %v903_v23 }
 0x662   : > { %v1331_v24 = vpop.eup %1330 }
 0x663   : > { %v905_v26 = vmul.f32 %v1331_v24, %v897_v17 }
 0x665   : > { %v912_v28 = vmul.f32 %v1194_v25, %v905_v26 }
 0x667   : > { %v919_v29 = vadd.f32 %v1195_v27, %v912_v28 }
 0x669   : > { %v920_v30 = vpack.c.bf16 %v919_v29, %v919_v29 }
 0x66b   : > { %1282 = vmatmul.mubr.msk.bf16.vlgmr.msra.gmra.mrb[16].mxu1 %vm504_vm1, %v920_v30 }
 0x73e   : > { %v981_v36 = vpop.f32.mrb[16].mxu1 }
 0x73f   : > { %v982_v37 = vadd.f32 %v1196_v35, %v981_v36  ;;  %v1283_v38 = vpop.f32.mrb[17].mxu1 }
 0x740   : > { %v984_v39 = vpop.f32.mrb[18].mxu1 }
 0x741   : > { %v988_v40 = vmul.f32 0.044715, %v982_v37  ;;  %v1284_v41 = vpop.f32.mrb[19].mxu1  ;;  %v987_v47 = vmul.f32 0.5, %v982_v37 }
 0x743   : > { %v989_v42 = vmul.f32 %v988_v40, %v982_v37 }
 0x745   : > { %v990_v43 = vmul.f32 %v989_v42, %v982_v37 }
 0x747   : > { %v991_v44 = vadd.f32 %v990_v43, %v982_v37 }
 0x749   : > { %v992_v45 = vmul.f32 0.7978846, %v991_v44 }
 0x74b   : > { %1332 = vtanh.f32 %v992_v45 }
 0x755   : > { %v1333_v46 = vpop.eup %1332 }
 0x756   : > { %v994_v48 = vadd.f32 1.0, %v1333_v46 }
 0x758   : > { %v995_v1 = vmul.f32 %v994_v48, %v987_v47 }
 0x75a   : > { %v996_v49 = vpack.c.bf16 %v995_v1, %v995_v1 }
 0x75c   : > { %1294 = vmatmul.mubr.msk.bf16.vlgmr.msra.gmra.mrb[12].mxu0 %vm1036_vm5, %v996_v49 }
 0x82f   : > { %v1074_v51 = vpop.f32.mrb[12].mxu0 }
 0x830   : > { %v1075_v52 = vadd.f32 %v1200_v50, %v1074_v51  ;;  %v1295_v53 = vpop.f32.mrb[13].mxu0 }
 0x831   : > { %v1077_v54 = vpop.f32.mrb[14].mxu0 }
 0x832   : > { %v1296_v55 = vpop.f32.mrb[15].mxu0  ;;  %v1080_v56 = vadd.f32 %v1075_v52, %v919_v29 }
 0x834   : > { %v1083_v57 = vsel %vm504_vm1, %v1080_v56, 0.0 }
 0x835   : > { %1084 = vadd.xlane.f32.xlu0 %v1083_v57 }
 0x8c2   : > { %v1085_v58 = vpop.xlane.xlu0 %1084 }
 0x8c3   : > { %v1086_v59 = vmul.f32 0.03125, %v1085_v58 }
 0x8c5   : > { %v1087_v60 = vsub.f32 %v1080_v56, %v1086_v59 }
 0x8c7   : > { %v1088_v61 = vmul.f32 %v1087_v60, %v1087_v60 }
 0x8c9   : > { %v1089_v62 = vsel %vm504_vm1, %v1088_v61, 0.0 }
 0x8ca   : > { %1090 = vadd.xlane.f32.xlu1 %v1089_v62 }
 0x957   : > { %v1091_v63 = vpop.xlane.xlu1 %1090 }
 0x958   : > { %v1092_v0 = vmul.f32 0.03125, %v1091_v63 }
 0x95a   : > { %v1093_v2 = vadd.f32 1e-12, %v1092_v0 }
 0x95c   : > { %1334 = vrsqrt.f32 %v1093_v2 }
 0x966   : > { %v1335_v4 = vpop.eup %1334 }
 0x967   : > { %v1095_v6 = vmul.f32 %v1335_v4, %v1087_v60 }
 0x969   : > { %v1102_v8 = vmul.f32 %v1206_v5, %v1095_v6 }
 0x96b   : > { %v1109_v9 = vadd.f32 %v1207_v7, %v1102_v8 }
 0x96d   : > { %1110 = vst.msk [vmem:[%s476_s26] sm:$0xff] %vm504_vm1, %v1109_v9 }
 0x96e PF: > { %s24_s29 = sadd.s32 1, %s1342_s29  }
 0x96f   : > { %p21_p4 = scmp.ge.s32.totalorder %s24_s29, 4  }
 0x971   :  { %23 = sbr.rel (!%p21_p4) target bundleno = 1 (0x1), region = 109 }

</bundles_post_ra>
